<compile_context>
chip_gen: v7x
topology: tpu7x:2x2x1
jax: 0.10.0
libtpu: 0.0.40
codegen_flags: <defaults>
</compile_context>

<pallas_src>
import functools

import jax
import jax.numpy as jnp
from jax.experimental import pallas as pl
from jax.experimental.pallas import tpu as pltpu


LANES = 128          # lane width of a vreg
TARGET_TILE_ROWS = 1024   # 1024 rows * 128 lanes * 3 feats * 4 B ~= 1.5 MiB per buffer


def _sigmoid(z):
    # Single EUP push (tanh) + 2 cheap VALU ops; numerically identical to 1/(1+exp(-z)).
    return 0.5 * jnp.tanh(0.5 * z) + 0.5


def simple_nn_kernel(params_ref, x_ref, o_ref):
    """params_ref: (24,) f32 in SMEM laid out as
         [0:9]   W1 (out,in) row-major, [9:12]  b1,
         [12:21] W2 (out,in) row-major, [21:24] b2.
       x_ref / o_ref: (3, TILE_ROWS, 128) — feature on the leading axis, batch dense
       across sublanes and lanes."""
    # Hoist all 24 scalar SMEM reads out of the FMA chain (read once per grid step).
    w1 = [[params_ref[3 * j + i] for i in range(3)] for j in range(3)]
    b1 = [params_ref[9 + j] for j in range(3)]
    w2 = [[params_ref[12 + 3 * j + i] for i in range(3)] for j in range(3)]
    b2 = [params_ref[21 + j] for j in range(3)]

    # Dense (TILE_ROWS, 128) slabs; compute in f32 regardless of storage dtype.
    x0 = x_ref[0].astype(jnp.float32)
    x1 = x_ref[1].astype(jnp.float32)
    x2 = x_ref[2].astype(jnp.float32)

    # Hidden layer: h_j = sigmoid(sum_i x_i * W1[j, i] + b1[j])  (== x @ W1.T + b1)
    h = []
    for j in range(3):
        z = x0 * w1[j][0] + x1 * w1[j][1] + x2 * w1[j][2] + b1[j]
        h.append(_sigmoid(z))

    # Output layer, stored straight into the caller's dtype (unmasked full-slab stores).
    for j in range(3):
        z = h[0] * w2[j][0] + h[1] * w2[j][1] + h[2] * w2[j][2] + b2[j]
        o_ref[j] = _sigmoid(z).astype(o_ref.dtype)


def simple_nn_reference(x, w1, b1, w2, b2):
    h = jax.nn.sigmoid(x @ w1.T + b1)
    return jax.nn.sigmoid(h @ w2.T + b2)


@functools.partial(jax.jit, static_argnames=("force_kernel",))
def simple_nn_forward(x, w1, b1, w2, b2, *, force_kernel=False):
    """x: (B, 3). w1/w2: PyTorch-layout (out, in) = (3, 3). b1/b2: (3,)."""
    B, F = x.shape
    assert F == 3
    dtype = x.dtype

    # Small-batch fast path: the kernel only pays off once B is thousands of rows;
    # below that it is pure launch + layout overhead, so use plain XLA.
    if B < 4096 and not force_kernel:
        return simple_nn_reference(x, w1, b1, w2, b2)

    # Pack the 24 parameter scalars for SMEM (PyTorch (out, in) layout preserved).
    params = jnp.concatenate(
        [w1.reshape(-1), b1.reshape(-1), w2.reshape(-1), b2.reshape(-1)]
    ).astype(jnp.float32)                                   # (24,)

    # --- batch tiling: dense (rows, 128) slabs per feature -----------------------------
    rows = pl.cdiv(B, LANES)                                # 128-wide row groups
    # Big tiles (~1.5 MiB f32 per buffer) but keep >=2 blocks when possible so the
    # "parallel" grid axis can shard across both v7x TensorCores.
    tile_rows = min(TARGET_TILE_ROWS, max(8, pl.cdiv(rows, 2)))
    tile_rows = pl.cdiv(tile_rows, 8) * 8                   # sublane multiple
    rows_pad = pl.cdiv(rows, tile_rows) * tile_rows
    b_pad = rows_pad * LANES
    n_blocks = rows_pad // tile_rows

    # One layout pass: pad batch, transpose to feature-major, reshape to (3, rows, 128).
    # (Padded tail elements compute sigmoid(bias) garbage and are sliced off below.)
    x_p = x if b_pad == B else jnp.pad(x, ((0, b_pad - B), (0, 0)))
    x3 = x_p.T.reshape(3, rows_pad, LANES)

    out3 = pl.pallas_call(
        simple_nn_kernel,
        out_shape=jax.ShapeDtypeStruct((3, rows_pad, LANES), dtype),
        grid=(n_blocks,),
        in_specs=[
            pl.BlockSpec(memory_space=pltpu.MemorySpace.SMEM),        # params (24,)
            pl.BlockSpec((3, tile_rows, LANES), lambda i: (0, i, 0)),  # x slab
        ],
        out_specs=pl.BlockSpec((3, tile_rows, LANES), lambda i: (0, i, 0)),
        compiler_params=pltpu.CompilerParams(
            dimension_semantics=("parallel",),
            # ~1.5 MiB per f32 buffer, double-buffered in+out ≈ 6 MiB: fits every
            # generation; set the limit explicitly so v5e/v7x never silently spill.
            vmem_limit_bytes=32 * 1024 * 1024,
        ),
    )(params, x3)

    # Undo layout: (3, rows_pad, 128) -> (3, B_pad) -> (B, 3).
    return out3.reshape(3, b_pad)[:, :B].T


if __name__ == "__main__":
    key = jax.random.PRNGKey(0)
    kx, k1, k2, k3, k4, kx2 = jax.random.split(key, 6)

    F = 3
    bound = 1.0 / jnp.sqrt(jnp.float32(F))
    w1 = jax.random.uniform(k1, (F, F), dtype=jnp.float32, minval=-bound, maxval=bound)
    b1 = jax.random.uniform(k2, (F,), dtype=jnp.float32, minval=-bound, maxval=bound)
    w2 = jax.random.uniform(k3, (F, F), dtype=jnp.float32, minval=-bound, maxval=bound)
    b2 = jax.random.uniform(k4, (F,), dtype=jnp.float32, minval=-bound, maxval=bound)

    # Small case matching the PyTorch spec (batch=2, features=3); force the Pallas path
    # so the kernel itself is exercised even at this tiny shape.
    B = 2
    x = jax.random.uniform(kx, (B, F), dtype=jnp.float32)
    out = jax.block_until_ready(simple_nn_forward(x, w1, b1, w2, b2, force_kernel=True))
    ref = simple_nn_reference(x, w1, b1, w2, b2)
    assert out.shape == (B, F)
    assert jnp.allclose(out, ref, atol=1e-5, rtol=1e-5)

    # Default dispatch at the small shape hits the plain-XLA fast path.
    out_fast = jax.block_until_ready(simple_nn_forward(x, w1, b1, w2, b2))
    assert jnp.allclose(out_fast, ref, atol=1e-5, rtol=1e-5)

    # Larger batch exercises the tiled, padded, multi-block (>=2 blocks) pipeline path.
    B2 = 8192
    x2 = jax.random.uniform(kx2, (B2, F), dtype=jnp.float32)
    out2 = jax.block_until_ready(simple_nn_forward(x2, w1, b1, w2, b2))
    ref2 = simple_nn_reference(x2, w1, b1, w2, b2)
    assert out2.shape == (B2, F)
    assert jnp.allclose(out2, ref2, atol=1e-5, rtol=1e-5)

    print("KERNEL_OK")
</pallas_src>

<mosaic_0001>
module attributes {stable_mosaic.version = 11 : i64} {
  func.func @simple_nn_kernel(%arg0: i32, %arg1: memref<24xf32, #tpu.memory_space<smem>>, %arg2: memref<3x8x128xf32, #tpu.memory_space<vmem>>, %arg3: memref<3x8x128xf32, #tpu.memory_space<vmem>>) attributes {dimension_semantics = [#tpu.dimension_semantics<parallel>], iteration_bounds = array<i64: 1>, scalar_prefetch = 0 : i64, scratch_operands = 0 : i64, tpu.core_type = #tpu.core_type<tc>, window_params = [{transform_indices = @transform_0, window_bounds = array<i64: 24>}, {transform_indices = @transform_1, window_bounds = array<i64: 3, 8, 128>}, {transform_indices = @transform_2, window_bounds = array<i64: 3, 8, 128>}]} {
    %c0 = arith.constant 0 : index
    %0 = memref.load %arg1[%c0] : memref<24xf32, #tpu.memory_space<smem>>
    %c1 = arith.constant 1 : index
    %1 = memref.load %arg1[%c1] : memref<24xf32, #tpu.memory_space<smem>>
    %c2 = arith.constant 2 : index
    %2 = memref.load %arg1[%c2] : memref<24xf32, #tpu.memory_space<smem>>
    %c3 = arith.constant 3 : index
    %3 = memref.load %arg1[%c3] : memref<24xf32, #tpu.memory_space<smem>>
    %c4 = arith.constant 4 : index
    %4 = memref.load %arg1[%c4] : memref<24xf32, #tpu.memory_space<smem>>
    %c5 = arith.constant 5 : index
    %5 = memref.load %arg1[%c5] : memref<24xf32, #tpu.memory_space<smem>>
    %c6 = arith.constant 6 : index
    %6 = memref.load %arg1[%c6] : memref<24xf32, #tpu.memory_space<smem>>
    %c7 = arith.constant 7 : index
    %7 = memref.load %arg1[%c7] : memref<24xf32, #tpu.memory_space<smem>>
    %c8 = arith.constant 8 : index
    %8 = memref.load %arg1[%c8] : memref<24xf32, #tpu.memory_space<smem>>
    %c9 = arith.constant 9 : index
    %9 = memref.load %arg1[%c9] : memref<24xf32, #tpu.memory_space<smem>>
    %c10 = arith.constant 10 : index
    %10 = memref.load %arg1[%c10] : memref<24xf32, #tpu.memory_space<smem>>
    %c11 = arith.constant 11 : index
    %11 = memref.load %arg1[%c11] : memref<24xf32, #tpu.memory_space<smem>>
    %c12 = arith.constant 12 : index
    %12 = memref.load %arg1[%c12] : memref<24xf32, #tpu.memory_space<smem>>
    %c13 = arith.constant 13 : index
    %13 = memref.load %arg1[%c13] : memref<24xf32, #tpu.memory_space<smem>>
    %c14 = arith.constant 14 : index
    %14 = memref.load %arg1[%c14] : memref<24xf32, #tpu.memory_space<smem>>
    %c15 = arith.constant 15 : index
    %15 = memref.load %arg1[%c15] : memref<24xf32, #tpu.memory_space<smem>>
    %c16 = arith.constant 16 : index
    %16 = memref.load %arg1[%c16] : memref<24xf32, #tpu.memory_space<smem>>
    %c17 = arith.constant 17 : index
    %17 = memref.load %arg1[%c17] : memref<24xf32, #tpu.memory_space<smem>>
    %c18 = arith.constant 18 : index
    %18 = memref.load %arg1[%c18] : memref<24xf32, #tpu.memory_space<smem>>
    %c19 = arith.constant 19 : index
    %19 = memref.load %arg1[%c19] : memref<24xf32, #tpu.memory_space<smem>>
    %c20 = arith.constant 20 : index
    %20 = memref.load %arg1[%c20] : memref<24xf32, #tpu.memory_space<smem>>
    %c21 = arith.constant 21 : index
    %21 = memref.load %arg1[%c21] : memref<24xf32, #tpu.memory_space<smem>>
    %c22 = arith.constant 22 : index
    %22 = memref.load %arg1[%c22] : memref<24xf32, #tpu.memory_space<smem>>
    %c23 = arith.constant 23 : index
    %23 = memref.load %arg1[%c23] : memref<24xf32, #tpu.memory_space<smem>>
    %c0_0 = arith.constant 0 : index
    %c0_1 = arith.constant 0 : index
    %c0_2 = arith.constant 0 : index
    %24 = vector.load %arg2[%c0_0, %c0_1, %c0_2] : memref<3x8x128xf32, #tpu.memory_space<vmem>>, vector<1x8x128xf32>
    %25 = vector.shape_cast %24 : vector<1x8x128xf32> to vector<8x128xf32>
    %c1_3 = arith.constant 1 : index
    %c0_4 = arith.constant 0 : index
    %c0_5 = arith.constant 0 : index
    %26 = vector.load %arg2[%c1_3, %c0_4, %c0_5] : memref<3x8x128xf32, #tpu.memory_space<vmem>>, vector<1x8x128xf32>
    %27 = vector.shape_cast %26 : vector<1x8x128xf32> to vector<8x128xf32>
    %c2_6 = arith.constant 2 : index
    %c0_7 = arith.constant 0 : index
    %c0_8 = arith.constant 0 : index
    %28 = vector.load %arg2[%c2_6, %c0_7, %c0_8] : memref<3x8x128xf32, #tpu.memory_space<vmem>>, vector<1x8x128xf32>
    %29 = vector.shape_cast %28 : vector<1x8x128xf32> to vector<8x128xf32>
    %30 = vector.broadcast %0 : f32 to vector<8x128xf32>
    %31 = arith.mulf %25, %30 : vector<8x128xf32>
    %32 = vector.broadcast %1 : f32 to vector<8x128xf32>
    %33 = arith.mulf %27, %32 : vector<8x128xf32>
    %34 = arith.addf %31, %33 : vector<8x128xf32>
    %35 = vector.broadcast %2 : f32 to vector<8x128xf32>
    %36 = arith.mulf %29, %35 : vector<8x128xf32>
    %37 = arith.addf %34, %36 : vector<8x128xf32>
    %38 = vector.broadcast %9 : f32 to vector<8x128xf32>
    %39 = arith.addf %37, %38 : vector<8x128xf32>
    %cst = arith.constant 5.000000e-01 : f32
    %40 = vector.broadcast %cst : f32 to vector<8x128xf32>
    %41 = arith.mulf %40, %39 : vector<8x128xf32>
    %42 = math.tanh %41 : vector<8x128xf32>
    %cst_9 = arith.constant 5.000000e-01 : f32
    %43 = vector.broadcast %cst_9 : f32 to vector<8x128xf32>
    %44 = arith.mulf %43, %42 : vector<8x128xf32>
    %cst_10 = arith.constant 5.000000e-01 : f32
    %45 = vector.broadcast %cst_10 : f32 to vector<8x128xf32>
    %46 = arith.addf %44, %45 : vector<8x128xf32>
    %47 = vector.broadcast %3 : f32 to vector<8x128xf32>
    %48 = arith.mulf %25, %47 : vector<8x128xf32>
    %49 = vector.broadcast %4 : f32 to vector<8x128xf32>
    %50 = arith.mulf %27, %49 : vector<8x128xf32>
    %51 = arith.addf %48, %50 : vector<8x128xf32>
    %52 = vector.broadcast %5 : f32 to vector<8x128xf32>
    %53 = arith.mulf %29, %52 : vector<8x128xf32>
    %54 = arith.addf %51, %53 : vector<8x128xf32>
    %55 = vector.broadcast %10 : f32 to vector<8x128xf32>
    %56 = arith.addf %54, %55 : vector<8x128xf32>
    %cst_11 = arith.constant 5.000000e-01 : f32
    %57 = vector.broadcast %cst_11 : f32 to vector<8x128xf32>
    %58 = arith.mulf %57, %56 : vector<8x128xf32>
    %59 = math.tanh %58 : vector<8x128xf32>
    %cst_12 = arith.constant 5.000000e-01 : f32
    %60 = vector.broadcast %cst_12 : f32 to vector<8x128xf32>
    %61 = arith.mulf %60, %59 : vector<8x128xf32>
    %cst_13 = arith.constant 5.000000e-01 : f32
    %62 = vector.broadcast %cst_13 : f32 to vector<8x128xf32>
    %63 = arith.addf %61, %62 : vector<8x128xf32>
    %64 = vector.broadcast %6 : f32 to vector<8x128xf32>
    %65 = arith.mulf %25, %64 : vector<8x128xf32>
    %66 = vector.broadcast %7 : f32 to vector<8x128xf32>
    %67 = arith.mulf %27, %66 : vector<8x128xf32>
    %68 = arith.addf %65, %67 : vector<8x128xf32>
    %69 = vector.broadcast %8 : f32 to vector<8x128xf32>
    %70 = arith.mulf %29, %69 : vector<8x128xf32>
    %71 = arith.addf %68, %70 : vector<8x128xf32>
    %72 = vector.broadcast %11 : f32 to vector<8x128xf32>
    %73 = arith.addf %71, %72 : vector<8x128xf32>
    %cst_14 = arith.constant 5.000000e-01 : f32
    %74 = vector.broadcast %cst_14 : f32 to vector<8x128xf32>
    %75 = arith.mulf %74, %73 : vector<8x128xf32>
    %76 = math.tanh %75 : vector<8x128xf32>
    %cst_15 = arith.constant 5.000000e-01 : f32
    %77 = vector.broadcast %cst_15 : f32 to vector<8x128xf32>
    %78 = arith.mulf %77, %76 : vector<8x128xf32>
    %cst_16 = arith.constant 5.000000e-01 : f32
    %79 = vector.broadcast %cst_16 : f32 to vector<8x128xf32>
    %80 = arith.addf %78, %79 : vector<8x128xf32>
    %81 = vector.broadcast %12 : f32 to vector<8x128xf32>
    %82 = arith.mulf %46, %81 : vector<8x128xf32>
    %83 = vector.broadcast %13 : f32 to vector<8x128xf32>
    %84 = arith.mulf %63, %83 : vector<8x128xf32>
    %85 = arith.addf %82, %84 : vector<8x128xf32>
    %86 = vector.broadcast %14 : f32 to vector<8x128xf32>
    %87 = arith.mulf %80, %86 : vector<8x128xf32>
    %88 = arith.addf %85, %87 : vector<8x128xf32>
    %89 = vector.broadcast %21 : f32 to vector<8x128xf32>
    %90 = arith.addf %88, %89 : vector<8x128xf32>
    %cst_17 = arith.constant 5.000000e-01 : f32
    %91 = vector.broadcast %cst_17 : f32 to vector<8x128xf32>
    %92 = arith.mulf %91, %90 : vector<8x128xf32>
    %93 = math.tanh %92 : vector<8x128xf32>
    %cst_18 = arith.constant 5.000000e-01 : f32
    %94 = vector.broadcast %cst_18 : f32 to vector<8x128xf32>
    %95 = arith.mulf %94, %93 : vector<8x128xf32>
    %cst_19 = arith.constant 5.000000e-01 : f32
    %96 = vector.broadcast %cst_19 : f32 to vector<8x128xf32>
    %97 = arith.addf %95, %96 : vector<8x128xf32>
    %c0_20 = arith.constant 0 : index
    %c0_21 = arith.constant 0 : index
    %c0_22 = arith.constant 0 : index
    %98 = vector.load %arg3[%c0_20, %c0_21, %c0_22] : memref<3x8x128xf32, #tpu.memory_space<vmem>>, vector<1x8x128xf32>
    %99 = vector.shape_cast %98 : vector<1x8x128xf32> to vector<8x128xf32>
    %100 = vector.shape_cast %97 : vector<8x128xf32> to vector<1x8x128xf32>
    tpu.vector_store %arg3[%c0_20, %c0_21, %c0_22], %100 {strides = array<i32>} : memref<3x8x128xf32, #tpu.memory_space<vmem>>, vector<1x8x128xf32>,
    %101 = vector.broadcast %15 : f32 to vector<8x128xf32>
    %102 = arith.mulf %46, %101 : vector<8x128xf32>
    %103 = vector.broadcast %16 : f32 to vector<8x128xf32>
    %104 = arith.mulf %63, %103 : vector<8x128xf32>
    %105 = arith.addf %102, %104 : vector<8x128xf32>
    %106 = vector.broadcast %17 : f32 to vector<8x128xf32>
    %107 = arith.mulf %80, %106 : vector<8x128xf32>
    %108 = arith.addf %105, %107 : vector<8x128xf32>
    %109 = vector.broadcast %22 : f32 to vector<8x128xf32>
    %110 = arith.addf %108, %109 : vector<8x128xf32>
    %cst_23 = arith.constant 5.000000e-01 : f32
    %111 = vector.broadcast %cst_23 : f32 to vector<8x128xf32>
    %112 = arith.mulf %111, %110 : vector<8x128xf32>
    %113 = math.tanh %112 : vector<8x128xf32>
    %cst_24 = arith.constant 5.000000e-01 : f32
    %114 = vector.broadcast %cst_24 : f32 to vector<8x128xf32>
    %115 = arith.mulf %114, %113 : vector<8x128xf32>
    %cst_25 = arith.constant 5.000000e-01 : f32
    %116 = vector.broadcast %cst_25 : f32 to vector<8x128xf32>
    %117 = arith.addf %115, %116 : vector<8x128xf32>
    %c1_26 = arith.constant 1 : index
    %c0_27 = arith.constant 0 : index
    %c0_28 = arith.constant 0 : index
    %118 = vector.load %arg3[%c1_26, %c0_27, %c0_28] : memref<3x8x128xf32, #tpu.memory_space<vmem>>, vector<1x8x128xf32>
    %119 = vector.shape_cast %118 : vector<1x8x128xf32> to vector<8x128xf32>
    %120 = vector.shape_cast %117 : vector<8x128xf32> to vector<1x8x128xf32>
    tpu.vector_store %arg3[%c1_26, %c0_27, %c0_28], %120 {strides = array<i32>} : memref<3x8x128xf32, #tpu.memory_space<vmem>>, vector<1x8x128xf32>,
    %121 = vector.broadcast %18 : f32 to vector<8x128xf32>
    %122 = arith.mulf %46, %121 : vector<8x128xf32>
    %123 = vector.broadcast %19 : f32 to vector<8x128xf32>
    %124 = arith.mulf %63, %123 : vector<8x128xf32>
    %125 = arith.addf %122, %124 : vector<8x128xf32>
    %126 = vector.broadcast %20 : f32 to vector<8x128xf32>
    %127 = arith.mulf %80, %126 : vector<8x128xf32>
    %128 = arith.addf %125, %127 : vector<8x128xf32>
    %129 = vector.broadcast %23 : f32 to vector<8x128xf32>
    %130 = arith.addf %128, %129 : vector<8x128xf32>
    %cst_29 = arith.constant 5.000000e-01 : f32
    %131 = vector.broadcast %cst_29 : f32 to vector<8x128xf32>
    %132 = arith.mulf %131, %130 : vector<8x128xf32>
    %133 = math.tanh %132 : vector<8x128xf32>
    %cst_30 = arith.constant 5.000000e-01 : f32
    %134 = vector.broadcast %cst_30 : f32 to vector<8x128xf32>
    %135 = arith.mulf %134, %133 : vector<8x128xf32>
    %cst_31 = arith.constant 5.000000e-01 : f32
    %136 = vector.broadcast %cst_31 : f32 to vector<8x128xf32>
    %137 = arith.addf %135, %136 : vector<8x128xf32>
    %c2_32 = arith.constant 2 : index
    %c0_33 = arith.constant 0 : index
    %c0_34 = arith.constant 0 : index
    %138 = vector.load %arg3[%c2_32, %c0_33, %c0_34] : memref<3x8x128xf32, #tpu.memory_space<vmem>>, vector<1x8x128xf32>
    %139 = vector.shape_cast %138 : vector<1x8x128xf32> to vector<8x128xf32>
    %140 = vector.shape_cast %137 : vector<8x128xf32> to vector<1x8x128xf32>
    tpu.vector_store %arg3[%c2_32, %c0_33, %c0_34], %140 {strides = array<i32>} : memref<3x8x128xf32, #tpu.memory_space<vmem>>, vector<1x8x128xf32>,
    return
  }
  func.func @transform_0(%arg0: i32) -> i32 {
    %c0_i32 = arith.constant 0 : i32
    %c0_i32_0 = arith.constant 0 : i32
    return %c0_i32 : i32
  }
  func.func @transform_1(%arg0: i32) -> (i32, i32, i32) {
    %c0_i32 = arith.constant 0 : i32
    %c0_i32_0 = arith.constant 0 : i32
    %c0_i32_1 = arith.constant 0 : i32
    return %c0_i32, %arg0, %c0_i32_0 : i32, i32, i32
  }
  func.func @transform_2(%arg0: i32) -> (i32, i32, i32) {
    %c0_i32 = arith.constant 0 : i32
    %c0_i32_0 = arith.constant 0 : i32
    %c0_i32_1 = arith.constant 0 : i32
    return %c0_i32, %arg0, %c0_i32_0 : i32, i32, i32
  }
}

</mosaic_0001>

<bundles_post_ra>
// kernel: simple_nn_forward.1
= control target key start
LH: loop header
LB: loop body
LE: loop exit
PB: predicated region body
PF: predicated region fallthrough
CT: control target
= control target key end

     0   :  { %7 = vsyncpa [#allocation3], 0  ;;  %s265_s0 = inlined_call_operand.vmem [shape: f32[24], index: 0, kind: input, shape index: {}]   ;;  %s266_s1 = inlined_call_operand.vmem [shape: f32[3,8,128], index: 1, kind: input, shape index: {}]   ;;  %s267_s2 = inlined_call_operand.vmem [shape: f32[3,8,128], index: 2, kind: output, shape index: {}]  }
   0x1   :  { %s14_s11 = sshll.u32 %s265_s0, 4  ;;  %s15_s11 = int_to_ptr.vmem [resolvable:$true] %s14_s11 }
   0x2   :  { %s187_s12 = scalar_lea.vmem %s15_s11, 16  ;;  %p192_p1 = scmp.lt.s32.totalorder %s15_s11, %s15_s11 }
   0x3   :  { %p188_p0 = scmp.ne.s32.totalorder %s15_s11, %s187_s12  ;;  %p193_p2 = scmp.lt.s32.totalorder %s187_s12, %s187_s12 }
   0x5   :  { %p194_p3 = por %p193_p2, %p192_p1 }
   0x7   :  { %p195_p4 = pnand %p194_p3, %p188_p0 }
   0x9   :  { %198 = shalt.err (!%p195_p4)
}
   0xa   :  { %s201_s13 = smov [#allocation2]  }
   0xb   :  { %17 = dma.vmem_to_smem %s15_s11, 16, %s201_s13, [#allocation3]  }
   0xc   :  { %199 = dma.done.wait [#allocation3], 16  }
   0xd   :  { %200 = vsyncadd [#allocation3], 4294967280 }
   0xe   :  { %23 = sfence }
   0xf   :  { %s24_s14 = sld [smem:[#allocation2]]  ;;  %s147_s15 = sld [smem:[#allocation2 + $0x1]]  ;;  %v48_v0 = vld [vmem:[%s266_s1] sm:$0xff]  ;;  %v170_v1 = vld [vmem:[%s266_s1 + $0x8] sm:$0xff]  ;;  %v171_v2 = vld [vmem:[%s266_s1 + $0x10] sm:$0xff] }
  0x10   :  { %s148_s16 = sld [smem:[#allocation2 + $0x2]]  ;;  %s149_s17 = sld [smem:[#allocation2 + $0x3]] }
  0x11   :  { %s150_s18 = sld [smem:[#allocation2 + $0x4]]  ;;  %s151_s19 = sld [smem:[#allocation2 + $0x5]] }
  0x12   :  { %s152_s0 = sld [smem:[#allocation2 + $0x6]]  ;;  %s153_s20 = sld [smem:[#allocation2 + $0x7]] }
  0x13   :  { %s154_s21 = sld [smem:[#allocation2 + $0x8]]  ;;  %s155_s22 = sld [smem:[#allocation2 + $0x9]] }
  0x14   :  { %s226_s27 = sld [smem:[#allocation2 + $0xa]]  ;;  %s231_s30 = sld [smem:[#allocation2 + $0xb]] }
  0x15   :  { %v53_v3 = vstv %s24_s14  ;;  %v55_v4 = vstv %s147_s15  ;;  %s158_s1 = sld [smem:[#allocation2 + $0xc]]  ;;  %s161_s3 = sld [smem:[#allocation2 + $0xf]] }
  0x16   :  { %v54_v5 = vmul.f32 %v53_v3, %v48_v0  ;;  %v56_v6 = vmul.f32 %v170_v1, %v55_v4  ;;  %v58_v7 = vstv %s148_s16  ;;  %v67_v8 = vstv %s149_s17  ;;  %s235_s4 = sld [smem:[#allocation2 + $0xd]]  ;;  %s164_s5 = sld [smem:[#allocation2 + $0x12]] }
  0x17   :  { %v59_v9 = vmul.f32 %v171_v2, %v58_v7  ;;  %v68_v10 = vmul.f32 %v67_v8, %v48_v0  ;;  %v69_v11 = vstv %s150_s18  ;;  %v72_v12 = vstv %s151_s19  ;;  %s162_s6 = sld [smem:[#allocation2 + $0x10]]  ;;  %s165_s7 = sld [smem:[#allocation2 + $0x13]] }
  0x18   :  { %v57_v13 = vadd.f32 %v56_v6, %v54_v5  ;;  %v70_v14 = vmul.f32 %v170_v1, %v69_v11  ;;  %v73_v15 = vmul.f32 %v171_v2, %v72_v12  ;;  %v81_v16 = vstv %s152_s0  ;;  %s237_s8 = sld [smem:[#allocation2 + $0xe]]  ;;  %s239_s9 = sld [smem:[#allocation2 + $0x11]] }
  0x19   :  { %v61_v17 = vstv %s155_s22  ;;  %v82_v18 = vmul.f32 %v81_v16, %v48_v0  ;;  %v83_v19 = vstv %s153_s20  ;;  %v86_v20 = vstv %s154_s21  ;;  %s241_s10 = sld [smem:[#allocation2 + $0x14]]  ;;  %s243_s11 = sld [smem:[#allocation2 + $0x15]] }
  0x1a   :  { %v60_v21 = vadd.f32 %v59_v9, %v57_v13  ;;  %v71_v22 = vadd.f32 %v70_v14, %v68_v10  ;;  %v84_v23 = vmul.f32 %v170_v1, %v83_v19  ;;  %v75_v24 = vstv %s226_s27  ;;  %s245_s12 = sld [smem:[#allocation2 + $0x16]]  ;;  %s247_s13 = sld [smem:[#allocation2 + $0x17]] }
  0x1b   :  { %v87_v25 = vmul.f32 %v171_v2, %v86_v20  ;;  %v89_v29 = vstv %s231_s30  ;;  %v95_v39 = vstv %s158_s1  ;;  %v110_v40 = vstv %s161_s3 }
  0x1c   :  { %v62_v26 = vadd.f32 %v61_v17, %v60_v21  ;;  %v74_v27 = vadd.f32 %v73_v15, %v71_v22  ;;  %v85_v28 = vadd.f32 %v84_v23, %v82_v18  ;;  %v126_v43 = vstv %s164_s5 }
  0x1d   :  { %v97_v45 = vstv %s235_s4  ;;  %v112_v46 = vstv %s162_s6  ;;  %v128_v47 = vstv %s165_s7 }
  0x1e   :  { %v63_v30 = vmul.f32 0.5, %v62_v26  ;;  %v76_v31 = vadd.f32 %v75_v24, %v74_v27  ;;  %v88_v32 = vadd.f32 %v87_v25, %v85_v28  ;;  %v100_v52 = vstv %s237_s8 }
  0x1f   :  { %v115_v53 = vstv %s239_s9  ;;  %v131_v55 = vstv %s241_s10  ;;  %v103_v0 = vstv %s243_s11 }
  0x20   :  { %175 = vtanh.f32 %v63_v30  ;;  %v77_v33 = vmul.f32 0.5, %v76_v31  ;;  %v90_v34 = vadd.f32 %v89_v29, %v88_v32  ;;  %v118_v1 = vstv %s245_s12 }
  0x21   :  { %v134_v6 = vstv %s247_s13 }
  0x22   :  { %177 = vtanh.f32 %v77_v33  ;;  %v91_v35 = vmul.f32 0.5, %v90_v34 }
  0x24   :  { %179 = vtanh.f32 %v91_v35 }
  0x2a   :  { %v176_v36 = vpop.eup %175 }
  0x2b   :  { %v65_v37 = vmul.f32 0.5, %v176_v36 }
  0x2c   :  { %v178_v38 = vpop.eup %177 }
  0x2d   :  { %v66_v41 = vadd.f32 0.5, %v65_v37  ;;  %v79_v42 = vmul.f32 0.5, %v178_v38 }
  0x2e   :  { %v180_v44 = vpop.eup %179 }
  0x2f   :  { %v80_v48 = vadd.f32 0.5, %v79_v42  ;;  %v93_v49 = vmul.f32 0.5, %v180_v44  ;;  %v96_v50 = vmul.f32 %v95_v39, %v66_v41  ;;  %v111_v51 = vmul.f32 %v110_v40, %v66_v41 }
  0x30   :  { %v127_v54 = vmul.f32 %v126_v43, %v66_v41 }
  0x31   :  { %v94_v56 = vadd.f32 0.5, %v93_v49  ;;  %v98_v57 = vmul.f32 %v97_v45, %v80_v48  ;;  %v113_v58 = vmul.f32 %v112_v46, %v80_v48  ;;  %v129_v59 = vmul.f32 %v128_v47, %v80_v48 }
  0x33   :  { %v99_v60 = vadd.f32 %v98_v57, %v96_v50  ;;  %v101_v61 = vmul.f32 %v100_v52, %v94_v56  ;;  %v114_v62 = vadd.f32 %v113_v58, %v111_v51  ;;  %v116_v63 = vmul.f32 %v115_v53, %v94_v56 }
  0x34   :  { %v130_v2 = vadd.f32 %v129_v59, %v127_v54  ;;  %v132_v3 = vmul.f32 %v131_v55, %v94_v56 }
  0x35   :  { %v102_v4 = vadd.f32 %v101_v61, %v99_v60  ;;  %v117_v5 = vadd.f32 %v116_v63, %v114_v62 }
  0x36   :  { %v133_v7 = vadd.f32 %v132_v3, %v130_v2 }
  0x37   :  { %v104_v8 = vadd.f32 %v103_v0, %v102_v4  ;;  %v119_v9 = vadd.f32 %v118_v1, %v117_v5 }
  0x38   :  { %v135_v10 = vadd.f32 %v134_v6, %v133_v7 }
  0x39   :  { %v105_v11 = vmul.f32 0.5, %v104_v8  ;;  %v120_v12 = vmul.f32 0.5, %v119_v9 }
  0x3a   :  { %v136_v13 = vmul.f32 0.5, %v135_v10 }
  0x3b   :  { %181 = vtanh.f32 %v105_v11 }
  0x3c   :  { %183 = vtanh.f32 %v120_v12 }
  0x3d   :  { %185 = vtanh.f32 %v136_v13 }
  0x45   :  { %v182_v14 = vpop.eup %181 }
  0x46   :  { %v184_v15 = vpop.eup %183  ;;  %v107_v16 = vmul.f32 0.5, %v182_v14 }
  0x47   :  { %v186_v17 = vpop.eup %185  ;;  %v122_v18 = vmul.f32 0.5, %v184_v15 }
  0x48   :  { %v108_v19 = vadd.f32 0.5, %v107_v16  ;;  %v138_v20 = vmul.f32 0.5, %v186_v17 }
  0x49   :  { %v123_v21 = vadd.f32 0.5, %v122_v18 }
  0x4a   :  { %109 = vst [vmem:[%s267_s2] sm:$0xff] %v108_v19  ;;  %v139_v22 = vadd.f32 0.5, %v138_v20 }
  0x4b   :  { %172 = vst [vmem:[%s267_s2 + $0x8] sm:$0xff] %v123_v21 }
  0x4c   :  { %173 = vst [vmem:[%s267_s2 + $0x10] sm:$0xff] %v139_v22 }
  0x4d   :  { %146 = vsyncpa [#allocation3], 1 }

</bundles_post_ra>
